<compile_context>
chip_gen: v6e
topology: v6e:2x2x1
jax: 0.10.0
libtpu: 0.0.40
codegen_flags: <defaults>
</compile_context>

<pallas_src>
import functools

import jax
import jax.numpy as jnp
from jax.experimental import pallas as pl
from jax.experimental.pallas import tpu as pltpu


def _round_up(a, b):
    return (a + b - 1) // b * b


def _cdiv(a, b):
    return (a + b - 1) // b


# --------------------------------------------------------------------------- #
# Kernel
# --------------------------------------------------------------------------- #
def _attention_gate_kernel(g_ref, x_ref, wg_ref, wx_ref, b_ref, wpsi_ref,
                           scal_ref, out_ref, *, psi_on_mxu, gate_in_f32,
                           mm_precision):
    # g_ref   : (F_g, TS)     x_ref  : (F_l, TS)   (spatial tile on lanes)
    # wg_ref  : (D, F_g)      wx_ref : (D, F_l)    (BN-folded 1x1 conv weights)
    # b_ref   : (D, 1)        folded bias of W_gate + W_x (conv bias + BN)
    # wpsi_ref: (1, D) if psi_on_mxu else (D, 1)   (folded psi conv+BN weight)
    # scal_ref: (2,) SMEM     [prelu_alpha, folded psi bias]
    # out_ref : (F_l, TS)
    g = g_ref[...]
    x = x_ref[...]

    # 1x1 convs as matmuls; f32 accumulation always.  precision=HIGHEST for
    # f32 inputs (PyTorch Conv2d parity), default for bf16 inputs.
    g1 = jnp.dot(wg_ref[...], g, preferred_element_type=jnp.float32,
                 precision=mm_precision)                                # (D, TS)
    x1 = jnp.dot(wx_ref[...], x, preferred_element_type=jnp.float32,
                 precision=mm_precision)                                # (D, TS)
    h = g1 + x1 + b_ref[...]

    # PReLU with scalar alpha (PyTorch default num_parameters=1).
    alpha = scal_ref[0]
    h = jnp.where(h > 0, h, alpha * h)

    # psi: single-channel projection.  MXU dot for large D, VPU mul + sublane
    # (XLU) reduction for small D.  Sigmoid runs on the EUP.
    if psi_on_mxu:
        p = jnp.dot(wpsi_ref[...], h, preferred_element_type=jnp.float32,
                    precision=mm_precision)                             # (1, TS)
    else:
        p = jnp.sum(h * wpsi_ref[...], axis=0, keepdims=True)          # (1, TS)
    p = jax.nn.sigmoid(p + scal_ref[1])

    # Gate the skip-connection features.
    if gate_in_f32:
        out_ref[...] = (x.astype(jnp.float32) * p).astype(out_ref.dtype)
    else:
        # bf16 gating (v6e / v7x): halves vreg + vld/vst pressure on the
        # largest elementwise tensor.
        out_ref[...] = (x * p.astype(x.dtype)).astype(out_ref.dtype)


# --------------------------------------------------------------------------- #
# Tiling / VMEM heuristics
# --------------------------------------------------------------------------- #
def _pick_tile_s(HW, N, per_lane_bytes, *, target_bytes=2 << 20,
                 floor_bytes=1 << 20, max_tile=32768):
    """Spatial tile (multiple of 128 lanes) sized by HBM traffic per grid step."""
    per_lane_bytes = max(1, per_lane_bytes)
    hw_pad = _round_up(HW, 128)

    tile = _round_up(max(128, target_bytes // per_lane_bytes), 128)
    tile = min(tile, hw_pad, max_tile)

    # Single-image inference: give v7x's two TensorCores >=2 parallel steps,
    # but never drop a step below ~1 MiB of traffic.
    if N == 1 and hw_pad >= 256:
        two_step = _round_up(_cdiv(hw_pad, 2), 128)
        floor = min(_round_up(max(128, floor_bytes // per_lane_bytes), 128), hw_pad)
        tile = min(tile, max(two_step, floor))

    # Rebalance: spread padding evenly over the step count.
    n_s = _cdiv(hw_pad, tile)
    tile = _round_up(_cdiv(hw_pad, n_s), 128)
    return tile, n_s


def _vmem_limit_bytes(est_bytes):
    """Per-generation scoped-VMEM limit (headroom on 64 MiB parts)."""
    try:
        phys = pltpu.get_tpu_info().vmem_capacity_bytes
    except Exception:  # pragma: no cover - conservative fallback
        phys = 64 << 20
    if phys <= (64 << 20):
        cap = 52 << 20      # v7x: leave headroom below 64 MiB physical VMEM
    else:
        cap = 104 << 20     # v5e / v6e: 128 MiB physical
    return int(min(max(2 * est_bytes, 32 << 20), cap))


# --------------------------------------------------------------------------- #
# Wrapper
# --------------------------------------------------------------------------- #
def attention_gate_pallas(g_nchw, x_nchw, params, *, target_tile_bytes=2 << 20):
    """g_nchw: (N, F_g, H, W), x_nchw: (N, F_l, H, W) -> (N, F_l, H, W)."""
    N, F_g, H, W = g_nchw.shape
    _, F_l, _, _ = x_nchw.shape
    D = params["wg"].shape[0]
    HW = H * W

    # NCHW -> (N, C, H*W): pure reshape (contiguous), no transpose round-trips.
    g_flat = g_nchw.reshape(N, F_g, HW)
    x_flat = x_nchw.reshape(N, F_l, HW)

    g_item = jnp.dtype(g_flat.dtype).itemsize
    x_item = jnp.dtype(x_flat.dtype).itemsize
    per_lane = F_g * g_item + 2 * F_l * x_item      # g read + x read + out write

    tile_s, n_s = _pick_tile_s(HW, N, per_lane, target_bytes=target_tile_bytes)
    S = tile_s * n_s
    if S != HW:
        pad = [(0, 0), (0, 0), (0, S - HW)]
        g_flat = jnp.pad(g_flat, pad)
        x_flat = jnp.pad(x_flat, pad)

    grid = (N, n_s)

    # psi path: MXU dot for deep gates, VPU/XLU path for small D.
    psi_on_mxu = D >= 64
    wpsi_f32 = params["wpsi"].astype(jnp.float32)
    wpsi_arg = wpsi_f32.reshape(1, D) if psi_on_mxu else wpsi_f32.reshape(D, 1)
    wpsi_spec = pl.BlockSpec((1, D) if psi_on_mxu else (D, 1),
                             lambda n, s: (0, 0))

    # bf16 gating only on chips with bf16 VALUs (v6e / v7x); f32 upcast on v5*.
    dev_kind = ""
    try:
        dev_kind = jax.devices()[0].device_kind.lower()
    except Exception:  # pragma: no cover
        pass
    is_v5 = "v5" in dev_kind
    gate_in_f32 = (x_flat.dtype != jnp.bfloat16) or is_v5

    mm_precision = (jax.lax.Precision.HIGHEST
                    if (g_flat.dtype == jnp.float32
                        and x_flat.dtype == jnp.float32)
                    else None)

    b_arg = params["b"].astype(jnp.float32).reshape(D, 1)
    scalars = jnp.concatenate(
        [params["alpha"].reshape(1), params["bpsi"].reshape(1)]
    ).astype(jnp.float32)

    # VMEM budget: double-buffered I/O blocks + weights + f32 intermediates.
    w_bytes = (params["wg"].size * params["wg"].dtype.itemsize
               + params["wx"].size * params["wx"].dtype.itemsize
               + b_arg.size * 4 + wpsi_arg.size * 4)
    est = 2 * tile_s * per_lane + w_bytes + tile_s * (2 * D + 4) * 4
    vmem_limit = _vmem_limit_bytes(est)

    cost = pl.CostEstimate(
        flops=2 * N * HW * D * (F_g + F_l + 1) + 6 * N * HW * D,
        transcendentals=N * HW,
        bytes_accessed=N * HW * per_lane + w_bytes,
    )

    kernel = functools.partial(_attention_gate_kernel,
                               psi_on_mxu=psi_on_mxu,
                               gate_in_f32=gate_in_f32,
                               mm_precision=mm_precision)

    full = lambda n, s: (0, 0)
    out_flat = pl.pallas_call(
        kernel,
        out_shape=jax.ShapeDtypeStruct((N, F_l, S), x_nchw.dtype),
        grid=grid,
        in_specs=[
            pl.BlockSpec((None, F_g, tile_s), lambda n, s: (n, 0, s)),   # g
            pl.BlockSpec((None, F_l, tile_s), lambda n, s: (n, 0, s)),   # x
            pl.BlockSpec((D, F_g), full),                                # wg (BN folded)
            pl.BlockSpec((D, F_l), full),                                # wx (BN folded)
            pl.BlockSpec((D, 1), full),                                  # folded bias
            wpsi_spec,                                                   # psi weight
            pl.BlockSpec(memory_space=pltpu.MemorySpace.SMEM),           # [alpha, bpsi]
        ],
        out_specs=pl.BlockSpec((None, F_l, tile_s), lambda n, s: (n, 0, s)),
        compiler_params=pltpu.CompilerParams(
            dimension_semantics=("parallel", "parallel"),
            vmem_limit_bytes=vmem_limit),
        cost_estimate=cost,
    )(g_flat, x_flat, params["wg"], params["wx"], b_arg, wpsi_arg, scalars)

    if S != HW:
        out_flat = out_flat[:, :, :HW]
    return out_flat.reshape(N, F_l, H, W)


# --------------------------------------------------------------------------- #
# Parameter construction (PyTorch-equivalent, BN folded for inference)
# --------------------------------------------------------------------------- #
def _fold_bn(w_oc_ic, b, gamma, beta, mean, var, eps=1e-5):
    """Fold inference-mode BatchNorm into a 1x1 conv (weight layout (Cout, Cin))."""
    s = gamma / jnp.sqrt(var + eps)                    # (Cout,)
    return w_oc_ic * s[:, None], (b - mean) * s + beta


def make_params(key, F_g, F_l, D, dtype=jnp.float32):
    ks = jax.random.split(key, 6)
    # Conv2d 1x1 weights in native PyTorch (Cout, Cin) layout.
    wg = jax.random.normal(ks[0], (D, F_g), dtype) * 0.1
    bg = jax.random.normal(ks[1], (D,), dtype) * 0.1
    wx = jax.random.normal(ks[2], (D, F_l), dtype) * 0.1
    bx = jax.random.normal(ks[3], (D,), dtype) * 0.1
    wpsi = jax.random.normal(ks[4], (1, D), dtype) * 0.1
    bpsi = jax.random.normal(ks[5], (1,), dtype) * 0.1

    # BatchNorm params at PyTorch default init, applied in inference mode.
    # TODO(synk): training-mode BatchNorm (batch statistics) is not folded here.
    ones_d, zeros_d = jnp.ones((D,), dtype), jnp.zeros((D,), dtype)
    ones_1, zeros_1 = jnp.ones((1,), dtype), jnp.zeros((1,), dtype)

    wg_e, bg_e = _fold_bn(wg, bg, ones_d, zeros_d, zeros_d, ones_d)
    wx_e, bx_e = _fold_bn(wx, bx, ones_d, zeros_d, zeros_d, ones_d)
    wpsi_e, bpsi_e = _fold_bn(wpsi, bpsi, ones_1, zeros_1, zeros_1, ones_1)

    return {
        "wg": wg_e,                                # (D, F_g)
        "wx": wx_e,                                # (D, F_l)
        "b": (bg_e + bx_e).reshape(D, 1),          # single folded bias
        "wpsi": wpsi_e.reshape(D, 1),              # psi weight
        "bpsi": bpsi_e.reshape(1),
        "alpha": jnp.full((1,), 0.25, dtype),      # PReLU default init
    }


def attention_gate_ref(g_nchw, x_nchw, p):
    """Pure-JAX reference (f32, HIGHEST precision) for correctness check."""
    N, F_g, H, W = g_nchw.shape
    F_l = x_nchw.shape[1]
    hi = jax.lax.Precision.HIGHEST
    g = g_nchw.reshape(N, F_g, H * W).astype(jnp.float32)
    x = x_nchw.reshape(N, F_l, H * W).astype(jnp.float32)
    g1 = jnp.einsum("df,nfs->nds", p["wg"].astype(jnp.float32), g, precision=hi)
    x1 = jnp.einsum("df,nfs->nds", p["wx"].astype(jnp.float32), x, precision=hi)
    h = g1 + x1 + p["b"][None].astype(jnp.float32)
    h = jnp.where(h > 0, h, p["alpha"][0].astype(jnp.float32) * h)
    psi = jax.nn.sigmoid(
        jnp.sum(h * p["wpsi"][None].astype(jnp.float32), axis=1, keepdims=True)
        + p["bpsi"][0].astype(jnp.float32))
    out = x * psi
    return out.reshape(N, F_l, H, W)


# --------------------------------------------------------------------------- #
# Self-test
# --------------------------------------------------------------------------- #
if __name__ == "__main__":
    key = jax.random.PRNGKey(0)
    k_g, k_x, k_p, k_g2, k_x2, k_p2 = jax.random.split(key, 6)

    # Case 1: tiny shallow gate (VPU/XLU psi path), f32, batch > 1.
    N, F_g, F_l, D, H, W = 2, 4, 4, 8, 16, 16
    g = jax.random.normal(k_g, (N, F_g, H, W), jnp.float32)
    x = jax.random.normal(k_x, (N, F_l, H, W), jnp.float32)
    params = make_params(k_p, F_g, F_l, D)

    out = jax.block_until_ready(attention_gate_pallas(g, x, params))
    ref = attention_gate_ref(g, x, params)
    assert out.shape == (N, F_l, H, W)
    assert jnp.allclose(out, ref, atol=1e-4, rtol=1e-4), "mismatch (f32, small D)"

    # Case 2: deeper gate (MXU psi path, D >= 64), batch 1 (N==1 tiling branch),
    # non-128-multiple spatial extent (padding + slice path).
    N2, F2, D2, H2, W2 = 1, 8, 128, 18, 30
    g2 = jax.random.normal(k_g2, (N2, F2, H2, W2), jnp.float32)
    x2 = jax.random.normal(k_x2, (N2, F2, H2, W2), jnp.float32)
    params2 = make_params(k_p2, F2, F2, D2)

    out2 = jax.block_until_ready(attention_gate_pallas(g2, x2, params2))
    ref2 = attention_gate_ref(g2, x2, params2)
    assert out2.shape == (N2, F2, H2, W2)
    assert jnp.allclose(out2, ref2, atol=1e-4, rtol=1e-4), "mismatch (f32, MXU psi)"

    # bf16 I/O path (halves HBM traffic on the dominant streams; f32 accumulation,
    # bf16 gating on v6e/v7x, f32 gating on v5e).
    params2_bf16 = dict(params2)
    params2_bf16["wg"] = params2["wg"].astype(jnp.bfloat16)
    params2_bf16["wx"] = params2["wx"].astype(jnp.bfloat16)
    out2_bf16 = jax.block_until_ready(
        attention_gate_pallas(g2.astype(jnp.bfloat16), x2.astype(jnp.bfloat16),
                              params2_bf16))
    assert out2_bf16.shape == (N2, F2, H2, W2)
    assert jnp.allclose(out2_bf16.astype(jnp.float32), ref2, atol=5e-2, rtol=5e-2), \
        "mismatch vs reference (bf16)"

    print("KERNEL_OK")
</pallas_src>

<mosaic_0001>
module attributes {stable_mosaic.version = 11 : i64} {
  func.func @_attention_gate_kernel(%arg0: i32, %arg1: i32, %arg2: memref<1x4x256xf32, #tpu.memory_space<vmem>>, %arg3: memref<1x4x256xf32, #tpu.memory_space<vmem>>, %arg4: memref<8x4xf32, #tpu.memory_space<vmem>>, %arg5: memref<8x4xf32, #tpu.memory_space<vmem>>, %arg6: memref<8x1xf32, #tpu.memory_space<vmem>>, %arg7: memref<8x1xf32, #tpu.memory_space<vmem>>, %arg8: memref<2xf32, #tpu.memory_space<smem>>, %arg9: memref<1x4x256xf32, #tpu.memory_space<vmem>>) attributes {dimension_semantics = [#tpu.dimension_semantics<parallel>, #tpu.dimension_semantics<parallel>], iteration_bounds = array<i64: 2, 1>, scalar_prefetch = 0 : i64, scratch_operands = 0 : i64, tpu.core_type = #tpu.core_type<tc>, window_params = [{transform_indices = @transform_0, window_bounds = array<i64: 1, 4, 256>}, {transform_indices = @transform_1, window_bounds = array<i64: 1, 4, 256>}, {pipeline_mode = #tpu.pipeline_mode<synchronous>, transform_indices = @transform_2, window_bounds = array<i64: 8, 4>}, {pipeline_mode = #tpu.pipeline_mode<synchronous>, transform_indices = @transform_3, window_bounds = array<i64: 8, 4>}, {pipeline_mode = #tpu.pipeline_mode<synchronous>, transform_indices = @transform_4, window_bounds = array<i64: 8, 1>}, {pipeline_mode = #tpu.pipeline_mode<synchronous>, transform_indices = @transform_5, window_bounds = array<i64: 8, 1>}, {transform_indices = @transform_6, window_bounds = array<i64: 2>}, {transform_indices = @transform_7, window_bounds = array<i64: 1, 4, 256>}]} {
    %c0 = arith.constant 0 : index
    %c0_0 = arith.constant 0 : index
    %c0_1 = arith.constant 0 : index
    %0 = vector.load %arg2[%c0, %c0_0, %c0_1] : memref<1x4x256xf32, #tpu.memory_space<vmem>>, vector<1x4x256xf32>
    %1 = vector.shape_cast %0 : vector<1x4x256xf32> to vector<4x256xf32>
    %c0_2 = arith.constant 0 : index
    %c0_3 = arith.constant 0 : index
    %c0_4 = arith.constant 0 : index
    %2 = vector.load %arg3[%c0_2, %c0_3, %c0_4] : memref<1x4x256xf32, #tpu.memory_space<vmem>>, vector<1x4x256xf32>
    %3 = vector.shape_cast %2 : vector<1x4x256xf32> to vector<4x256xf32>
    %c0_5 = arith.constant 0 : index
    %c0_6 = arith.constant 0 : index
    %4 = vector.load %arg4[%c0_5, %c0_6] : memref<8x4xf32, #tpu.memory_space<vmem>>, vector<8x4xf32>
    %cst = arith.constant dense<0.000000e+00> : vector<8x256xf32>
    %5 = tpu.matmul %4, %1, %cst {dimension_numbers = #tpu.dot_dimension_numbers<[1], [0], [0], [1], [0, 0, 1, 1], [], []>, precision = #tpu.contract_precision<fp32>} : vector<8x4xf32>, vector<4x256xf32>, vector<8x256xf32> -> vector<8x256xf32>
    %c0_7 = arith.constant 0 : index
    %c0_8 = arith.constant 0 : index
    %6 = vector.load %arg5[%c0_7, %c0_8] : memref<8x4xf32, #tpu.memory_space<vmem>>, vector<8x4xf32>
    %cst_9 = arith.constant dense<0.000000e+00> : vector<8x256xf32>
    %7 = tpu.matmul %6, %3, %cst_9 {dimension_numbers = #tpu.dot_dimension_numbers<[1], [0], [0], [1], [0, 0, 1, 1], [], []>, precision = #tpu.contract_precision<fp32>} : vector<8x4xf32>, vector<4x256xf32>, vector<8x256xf32> -> vector<8x256xf32>
    %8 = arith.addf %5, %7 : vector<8x256xf32>
    %c0_10 = arith.constant 0 : index
    %c0_11 = arith.constant 0 : index
    %9 = vector.load %arg6[%c0_10, %c0_11] : memref<8x1xf32, #tpu.memory_space<vmem>>, vector<8x1xf32>
    %10 = vector.broadcast %9 : vector<8x1xf32> to vector<8x256xf32>
    %11 = arith.addf %8, %10 : vector<8x256xf32>
    %c0_12 = arith.constant 0 : index
    %12 = memref.load %arg8[%c0_12] : memref<2xf32, #tpu.memory_space<smem>>
    %cst_13 = arith.constant 0.000000e+00 : f32
    %13 = vector.broadcast %cst_13 : f32 to vector<8x256xf32>
    %14 = arith.cmpf ogt, %11, %13 : vector<8x256xf32>
    %15 = vector.broadcast %12 : f32 to vector<8x256xf32>
    %16 = arith.mulf %15, %11 : vector<8x256xf32>
    %17 = arith.select %14, %11, %16 : vector<8x256xi1>, vector<8x256xf32>
    %c0_14 = arith.constant 0 : index
    %c0_15 = arith.constant 0 : index
    %18 = vector.load %arg7[%c0_14, %c0_15] : memref<8x1xf32, #tpu.memory_space<vmem>>, vector<8x1xf32>
    %19 = vector.broadcast %18 : vector<8x1xf32> to vector<8x256xf32>
    %20 = arith.mulf %17, %19 : vector<8x256xf32>
    %cst_16 = arith.constant dense<0.000000e+00> : vector<256xf32>
    %21 = vector.multi_reduction <add>, %20, %cst_16 [0] : vector<8x256xf32> to vector<256xf32>
    %22 = vector.shape_cast %21 : vector<256xf32> to vector<1x256xf32>
    %c1 = arith.constant 1 : index
    %23 = memref.load %arg8[%c1] : memref<2xf32, #tpu.memory_space<smem>>
    %24 = vector.broadcast %23 : f32 to vector<1x256xf32>
    %25 = arith.addf %22, %24 : vector<1x256xf32>
    %26 = arith.negf %25 : vector<1x256xf32>
    %27 = math.exp %26 : vector<1x256xf32>
    %cst_17 = arith.constant 1.000000e+00 : f32
    %28 = vector.broadcast %cst_17 : f32 to vector<1x256xf32>
    %29 = arith.addf %28, %27 : vector<1x256xf32>
    %30 = arith.divf %28, %29 : vector<1x256xf32>
    %31 = vector.broadcast %30 : vector<1x256xf32> to vector<4x256xf32>
    %32 = arith.mulf %3, %31 : vector<4x256xf32>
    %c0_18 = arith.constant 0 : index
    %c0_19 = arith.constant 0 : index
    %c0_20 = arith.constant 0 : index
    %33 = vector.load %arg9[%c0_18, %c0_19, %c0_20] : memref<1x4x256xf32, #tpu.memory_space<vmem>>, vector<1x4x256xf32>
    %34 = vector.shape_cast %33 : vector<1x4x256xf32> to vector<4x256xf32>
    %35 = vector.shape_cast %32 : vector<4x256xf32> to vector<1x4x256xf32>
    tpu.vector_store %arg9[%c0_18, %c0_19, %c0_20], %35 {strides = array<i32>} : memref<1x4x256xf32, #tpu.memory_space<vmem>>, vector<1x4x256xf32>,
    return
  }
  func.func @transform_0(%arg0: i32, %arg1: i32) -> (i32, i32, i32) {
    %c0_i32 = arith.constant 0 : i32
    %c0_i32_0 = arith.constant 0 : i32
    return %arg0, %c0_i32, %arg1 : i32, i32, i32
  }
  func.func @transform_1(%arg0: i32, %arg1: i32) -> (i32, i32, i32) {
    %c0_i32 = arith.constant 0 : i32
    %c0_i32_0 = arith.constant 0 : i32
    return %arg0, %c0_i32, %arg1 : i32, i32, i32
  }
  func.func @transform_2(%arg0: i32, %arg1: i32) -> (i32, i32) {
    %c0_i32 = arith.constant 0 : i32
    %c0_i32_0 = arith.constant 0 : i32
    %c0_i32_1 = arith.constant 0 : i32
    return %c0_i32, %c0_i32_0 : i32, i32
  }
  func.func @transform_3(%arg0: i32, %arg1: i32) -> (i32, i32) {
    %c0_i32 = arith.constant 0 : i32
    %c0_i32_0 = arith.constant 0 : i32
    %c0_i32_1 = arith.constant 0 : i32
    return %c0_i32, %c0_i32_0 : i32, i32
  }
  func.func @transform_4(%arg0: i32, %arg1: i32) -> (i32, i32) {
    %c0_i32 = arith.constant 0 : i32
    %c0_i32_0 = arith.constant 0 : i32
    %c0_i32_1 = arith.constant 0 : i32
    return %c0_i32, %c0_i32_0 : i32, i32
  }
  func.func @transform_5(%arg0: i32, %arg1: i32) -> (i32, i32) {
    %c0_i32 = arith.constant 0 : i32
    %c0_i32_0 = arith.constant 0 : i32
    %c0_i32_1 = arith.constant 0 : i32
    return %c0_i32, %c0_i32_0 : i32, i32
  }
  func.func @transform_6(%arg0: i32, %arg1: i32) -> i32 {
    %c0_i32 = arith.constant 0 : i32
    %c0_i32_0 = arith.constant 0 : i32
    return %c0_i32 : i32
  }
  func.func @transform_7(%arg0: i32, %arg1: i32) -> (i32, i32, i32) {
    %c0_i32 = arith.constant 0 : i32
    %c0_i32_0 = arith.constant 0 : i32
    return %arg0, %c0_i32, %arg1 : i32, i32, i32
  }
}

</mosaic_0001>

<bundles_post_ra>
// kernel: tpu_custom_call.1
= control target key start
LH: loop header
LB: loop body
LE: loop exit
PB: predicated region body
PF: predicated region fallthrough
CT: control target
= control target key end

     0   :  { %12 = vsyncpa [#allocation4], 0  ;;  %s1907_s0 = inlined_call_operand.vmem [shape: f32[2,4,256], index: 0, kind: input, shape index: {}]   ;;  %s1908_s1 = inlined_call_operand.vmem [shape: f32[2,4,256], index: 1, kind: input, shape index: {}]   ;;  %s1909_s2 = inlined_call_operand.vmem [shape: f32[8,4], index: 2, kind: input, shape index: {}]   ;;  %s1910_s3 = inlined_call_operand.vmem [shape: f32[8,4], index: 3, kind: input, shape index: {}]   ;;  %s1911_s4 = inlined_call_operand.vmem [shape: f32[8,1], index: 4, kind: input, shape index: {}]   ;;  %s1912_s5 = inlined_call_operand.vmem [shape: f32[8,1], index: 5, kind: input, shape index: {}]   ;;  %s1913_s6 = inlined_call_operand.vmem [shape: f32[2], index: 6, kind: input, shape index: {}]   ;;  %s1914_s7 = inlined_call_operand.hbm [shape: f32[2,4,256], index: 7, kind: output, shape index: {}]  }
   0x1   :  { %13 = vsyncpa [#allocation3], 0 }
   0x2   :  { %15 = vsyncpa [#allocation3 + $0x1], 0  ;;  %s1736_s24 = smov 0   ;;  %s1738_s25 = smov 0  }
   0x3   :  { %s1740_s26 = smov 0   ;;  %s1742_s27 = smov 0  }
   0x4   :  { %s1744_s28 = smov 0   ;;  %s1746_s29 = smov 0  }
   0x5 LB: > { %s1493_s30 = sadd.s32 4294967295, %s1690_s29   ;;  %s1494_s8 = sadd.s32 4294967294, %s1690_s29   ;;  %s1690_s29 = sphi %s1746_s29, %s21_s29   ;;  %s1686_s28 = sphi %s1744_s28, %s1923_s28   ;;  %s1682_s27 = sphi %s1742_s27, %s1922_s27   ;;  %s1678_s26 = sphi %s1740_s26, %s1921_s26   ;;  %s1674_s25 = sphi %s1738_s25, %s1920_s25   ;;  %s1670_s24 = sphi %s1736_s24, %s1919_s24  }
   0x6   : > { %s33_s9 = sadd.s32 1, %s1686_s28  ;;  %s203_s10 = sadd.s32 1, %s1678_s26 }
   0x7   : > { %p35_p0 = scmp.ge.s32.totalorder %s33_s9, 2  ;;  %p213_p1 = scmp.ne.s32.totalorder %s1678_s26, %s1674_s25 }
   0x8   : > { %p214_p2 = scmp.eq.s32.totalorder %s1493_s30, 1  ;;  %p219_p3 = scmp.ne.s32.totalorder %s1674_s25, %s1670_s24 }
   0x9   : > { %s1925_s9 = smov (%p35_p0, %s33_s9), 0  ;;  %p220_p5 = scmp.eq.s32.totalorder %s1494_s8, 1 }
   0xa   : > { %p1776_p4 = por %p214_p2, %p213_p1  ;;  %s198_s12 = ssub.s32 %s1686_s28, %s1925_s9 }
   0xb   : > { %p1495_p6 = scmp.ge.s32.totalorder %s1690_s29, 1  ;;  %p201_p7 = scmp.eq.s32.totalorder %s198_s12, 0 }
   0xc   : > { %p1783_p8 = por %p220_p5, %p219_p3  ;;  %p227_p9 = scmp.lt.s32.totalorder %s1690_s29, 3 }
   0xd   : > { %s1789_s14 = scalar_select %p201_p7, %s1678_s26, %s203_s10  }
   0xe   : > { %p1791_p10 = pnand %p1495_p6, %p227_p9  ;;  %p1795_p11 = scmp.eq.s32.totalorder %s1493_s30, 0 }
   0xf   : > { %s252_s19 = sshll.u32 %s1913_s6, 4  ;;  %s253_s19 = int_to_ptr.vmem [resolvable:$true] %s252_s19 }
  0x10   : > { %p1522_p12 = pneg %p1791_p10  ;;  %s1595_s20 = scalar_lea.vmem %s253_s19, 16 }
  0x11   : > { %p1596_p0 = scmp.ne.s32.totalorder %s253_s19, %s1595_s20  ;;  %p1603_p5 = scmp.lt.s32.totalorder %s253_s19, %s253_s19 }
  0x12   : > { %p1523_p13 = pnand %p1795_p11, %p1522_p12  ;;  %p1604_p6 = scmp.lt.s32.totalorder %s1595_s20, %s1595_s20 }
  0x14   : > { %p1597_p1 = pneg %p1523_p13  ;;  %p1605_p7 = por %p1604_p6, %p1603_p5 }
  0x16   : > { %p1598_p2 = pnand %p1597_p1, %p1596_p0 }
  0x18   : > { %p1599_p3 = pneg %p1598_p2 }
  0x1a   : > { %p1606_p9 = pnand %p1605_p7, %p1599_p3 }
  0x1c   : > { %1609 = shalt.err (!%p1606_p9)
}
  0x1d   : > { %s1692_s21 = smov [#allocation2]   ;;  %291 = sbr.rel (%p1791_p10) target bundleno = 346 (0x15a), region = 48 }
  0x1e   : > { %1525 = dma.vmem_to_smem (!%p1523_p13), %s253_s19, 16, %s1692_s21, [#allocation4]  }
  0x22   : > { %1661 = dma.done.wait (%p1795_p11), [#allocation4], 16  }
  0x23   : > { %1663 = vsyncadd (%p1795_p11), [#allocation4], 4294967280 }
  0x24   : > { %297 = sfence }
  0x25   : > { %p338_p12 = scmp.lt.s32.totalorder %s1682_s27, 1  ;;  %v361_v0 = vld [vmem:[%s1910_s3] sm:$0xff]  ;;  %vm364_vm0 = vcmask 31744   ;;  %v1693_v1 = vmov 0.0   ;;  %v1694_v6 = vmov 0   ;;  %vm368_vm1 = vcmask 1043456  }
  0x26   : > { %439 = vmatprep.mubr.f32.mxu0 %v1693_v1  ;;  %v366_v2 = vsel %vm364_vm0, %v361_v0, 0  ;;  %525 = vmatprep.mubr.f32.mxu1 %v1693_v1  ;;  %v1312_v3 = vld [vmem:[%s1911_s4] sm:$0xff]  ;;  %s1320_s8 = sld [smem:[#allocation2]]  ;;  %s334_s12 = sand.u32 1, %s1674_s25  }
  0x27   : > { %s339_s10 = scalar_select %p338_p12, %s1682_s27, 1  ;;  %v360_v4 = vld [vmem:[%s1909_s2] sm:$0xff]  ;;  %v1826_v5 = vand.u32 4294901760, %v366_v2  ;;  %1584 = vset.pattern.permute.xlu0 %v1694_v6 }
  0x28   : > { %1315 = vperm.xlu0 %1584, %v1312_v3   ;;  %v1328_v8 = vld [vmem:[%s1912_s5] sm:$0xff]  ;;  %v841_v9 = vsel %vm364_vm0, %v360_v4, 0  ;;  %s1500_s15 = sshll.u32 %s334_s12, 3  ;;  %s1371_s22 = scalar_lea.sflag [#allocation3], %s334_s12 }
  0x29   : > { %s1513_s16 = sshll.u32 %s339_s10, 3  ;;  %v441_v7 = vsub.f32 %v366_v2, %v1826_v5  ;;  %v1845_v18 = vand.u32 4294901760, %v841_v9  ;;  %s1505_s10 = sld [smem:[#allocation2 + $0x1]] }
  0x2a   : > { %s355_s21 = scalar_lea.vmem %s1908_s1, %s1513_s16  ;;  %s345_s30 = scalar_lea.vmem %s1907_s0, %s1513_s16 }
  0x2b   : > { %v1839_v10 = vld [vmem:[%s355_s21] sm:$0xff]  ;;  %v442_v11 = vand.u32 4294901760, %v441_v7  ;;  %v915_v30 = vsub.f32 %v841_v9, %v1845_v18  ;;  %s1515_s16 = sshll.u32 %s1682_s27, 7  ;;  %s336_s17 = scalar_lea.vmem [#allocation5], %s1500_s15 }
  0x2c   : > { %v358_v12 = vld [vmem:[%s345_s30] sm:$0xff]  ;;  %v363_v13 = vcombine.high %v1839_v10, %v1839_v10  ;;  %v369_v14 = vsel %vm368_vm1, %v1839_v10, 0  ;;  %1331 = vperm.xlu0 %1584, %v1328_v8   ;;  %s1387_s18 = sshll.u32 %s336_s17, 4  ;;  %s1385_s21 = scalar_lea.hbm %s1914_s7, %s1515_s16  ;;  %s1388_s18 = int_to_ptr.vmem [resolvable:$true] %s1387_s18 }
  0x2d   : > { %v839_v15 = vcombine.high %v358_v12, %v358_v12  ;;  %v405_v16 = vand.u32 4294901760, %v369_v14  ;;  %v443_v17 = vsub.f32 %v441_v7, %v442_v11  ;;  %v843_v19 = vsel %vm368_vm1, %v358_v12, 0  ;;  %s1610_s23 = scalar_lea.vmem %s1388_s18, 128  ;;  %s1695_s30 = smov [#allocation5]  }
  0x2e   : > { %v371_v20 = vsel %vm368_vm1, %v363_v13, 0  ;;  %v879_v26 = vand.u32 4294901760, %v843_v19  ;;  %v916_v36 = vand.u32 4294901760, %v915_v30  ;;  %p1611_p10 = scmp.ne.s32.totalorder %s1388_s18, %s1610_s23 }
  0x2f   : > { %v845_v21 = vsel %vm368_vm1, %v839_v15, 0  ;;  %v403_v22 = vand.u32 4294901760, %v371_v20  ;;  %v444_v23 = vand.u32 4294901760, %v443_v17  ;;  %v488_v24 = vsub.f32 %v369_v14, %v405_v16 }
  0x30   : > { %v877_v25 = vand.u32 4294901760, %v845_v21  ;;  %v962_v33 = vsub.f32 %v843_v19, %v879_v26  ;;  %v917_v41 = vsub.f32 %v915_v30, %v916_v36  ;;  %p1612_p11 = pnand %p1611_p10, %p1776_p4 }
  0x31   : > { %404 = vmatprep.subr.mxu0 %v403_v22  ;;  %v482_v27 = vsub.f32 %v371_v20, %v403_v22  ;;  %v489_v28 = vand.u32 4294901760, %v488_v24 }
  0x32   : > { %v956_v29 = vsub.f32 %v845_v21, %v877_v25  ;;  %406 = vmatpush1.msra.mxu0 %v405_v16  ;;  %v963_v39 = vand.u32 4294901760, %v962_v33  ;;  %v918_v44 = vand.u32 4294901760, %v917_v41  ;;  %p1613_p13 = pneg %p1612_p11 }
  0x33   : > { %445 = vmatmul.mubr.f32.vlgmr.msra.gmra.mxu0 %v444_v23  ;;  %v483_v31 = vand.u32 4294901760, %v482_v27  ;;  %565 = vmatprep.subr.mxu0 %v482_v27  ;;  %v490_v32 = vsub.f32 %v488_v24, %v489_v28 }
  0x34   : > { %568 = vmatpush1.msra.mxu0 %v488_v24  ;;  %601 = vmatprep.mubr.f32.mxu0 %v1693_v1  ;;  %v957_v35 = vand.u32 4294901760, %v956_v29  ;;  %v964_v42 = vsub.f32 %v962_v33, %v963_v39 }
  0x35   : > { %v484_v34 = vsub.f32 %v482_v27, %v483_v31  ;;  %719 = vmatprep.subr.mxu0 %v483_v31  ;;  %v491_v37 = vand.u32 4294901760, %v490_v32 }
  0x36   : > { %v958_v40 = vsub.f32 %v956_v29, %v957_v35  ;;  %v965_v45 = vand.u32 4294901760, %v964_v42 }
  0x37   : > { %v485_v38 = vand.u32 4294901760, %v484_v34  ;;  %604 = vmatmul.mubr.f32.vlgmr.msra.gmra.mxu0 %v441_v7 }
  0x38   : > { %723 = vmatpush1.msra.mxu0 %v489_v28  ;;  %756 = vmatprep.mubr.f32.mxu0 %v1693_v1  ;;  %v959_v43 = vand.u32 4294901760, %v958_v40 }
  0x39   : > { %486 = vmatprep.subr.mxu1 %v485_v38  ;;  %878 = vmatprep.subr.mxu0 %v877_v25 }
  0x3a   : > { %492 = vmatpush1.msra.mxu1 %v491_v37 }
  0x3b   : > { %527 = vmatmul.mubr.f32.vlgmr.msra.gmra.mxu1 %v1826_v5  ;;  %641 = vmatprep.subr.mxu1 %v403_v22 }
  0x3c   : > { %643 = vmatpush1.msra.mxu1 %v405_v16  ;;  %676 = vmatprep.mubr.f32.mxu1 %v1693_v1 }
  0x3d   : > { %795 = vmatprep.subr.mxu1 %v403_v22  ;;  %758 = vmatmul.mubr.f32.vlgmr.msra.gmra.mxu0 %v1826_v5 }
  0x3e   : > { %880 = vmatpush1.msra.mxu0 %v879_v26  ;;  %913 = vmatprep.mubr.f32.mxu0 %v1693_v1 }
  0x3f   : > { %680 = vmatmul.mubr.f32.vlgmr.msra.gmra.mxu1 %v442_v11  ;;  %1039 = vmatprep.subr.mxu0 %v956_v29  ;;  %v1323_v29 = vstv %s1320_s8  ;;  %s1614_s8 = sshll.u32 %s1695_s30, 4  ;;  %s1615_s8 = int_to_ptr.vmem [resolvable:$false] %s1614_s8 }
  0x40   : > { %797 = vmatpush1.msra.mxu1 %v405_v16  ;;  %830 = vmatprep.mubr.f32.mxu1 %v1693_v1  ;;  %s1616_s27 = scalar_lea.vmem %s1615_s8, 256  ;;  %p1617_p0 = scmp.lt.s32.totalorder %s1388_s18, %s1615_s8 }
  0x41   : > { %960 = vmatprep.subr.mxu1 %v959_v43  ;;  %919 = vmatmul.mubr.f32.vlgmr.msra.gmra.mxu0 %v918_v44  ;;  %p1618_p1 = scmp.lt.s32.totalorder %s1616_s27, %s1610_s23 }
  0x42   : > { %1042 = vmatpush1.msra.mxu0 %v962_v33  ;;  %1075 = vmatprep.mubr.f32.mxu0 %v1693_v1 }
  0x43   : > { %832 = vmatmul.mubr.f32.vlgmr.msra.gmra.mxu1 %v1826_v5  ;;  %1193 = vmatprep.subr.mxu0 %v957_v35  ;;  %p1619_p2 = por %p1618_p1, %p1617_p0 }
  0x44   : > { %966 = vmatpush1.msra.mxu1 %v965_v45  ;;  %999 = vmatprep.mubr.f32.mxu1 %v1693_v1 }
  0x45   : > { %1115 = vmatprep.subr.mxu1 %v877_v25  ;;  %1078 = vmatmul.mubr.f32.vlgmr.msra.gmra.mxu0 %v915_v30  ;;  %p1620_p3 = pnand %p1619_p2, %p1613_p13 }
  0x46   : > { %1197 = vmatpush1.msra.mxu0 %v963_v39  ;;  %1230 = vmatprep.mubr.f32.mxu0 %v1693_v1 }
  0x47   : > { %1001 = vmatmul.mubr.f32.vlgmr.msra.gmra.mxu1 %v1845_v18 }
  0x48   : > { %1117 = vmatpush1.msra.mxu1 %v879_v26  ;;  %1150 = vmatprep.mubr.f32.mxu1 %v1693_v1 }
  0x49   : > { %1269 = vmatprep.subr.mxu1 %v877_v25  ;;  %1232 = vmatmul.mubr.f32.vlgmr.msra.gmra.mxu0 %v1845_v18 }
  0x4b   : > { %1154 = vmatmul.mubr.f32.vlgmr.msra.gmra.mxu1 %v916_v36 }
  0x4c   : > { %1271 = vmatpush1.msra.mxu1 %v879_v26  ;;  %1304 = vmatprep.mubr.f32.mxu1 %v1693_v1 }
  0x4f   : > { %1306 = vmatmul.mubr.f32.vlgmr.msra.gmra.mxu1 %v1845_v18 }
  0xa3   : > { %v1316_v27 = vpop.permute.xlu0 %1315 }
  0xa7   : > { %v1332_v34 = vpop.permute.xlu0 %1331 }
  0xf3   : > { %v446_v46 = vpop.f32.mrf.mxu0 }
  0xf5   : > { %v448_v47 = vpop.f32.mrf.mxu0 }
  0xf7   : > { %v605_v48 = vpop.f32.mrf.mxu0 }
  0xf9   : > { %v607_v49 = vpop.f32.mrf.mxu0 }
  0xfb   : > { %v528_v50 = vpop.f32.mrf.mxu1 }
  0xfc   : > { %v529_v51 = vadd.f32 %v528_v50, %v446_v46 }
  0xfd   : > { %v530_v52 = vpop.f32.mrf.mxu1  ;;  %v759_v53 = vpop.f32.mrf.mxu0 }
  0xfe   : > { %v606_v54 = vadd.f32 %v605_v48, %v529_v51  ;;  %v531_v55 = vadd.f32 %v530_v52, %v448_v47 }
  0xff   : > { %v681_v56 = vpop.f32.mrf.mxu1  ;;  %v761_v57 = vpop.f32.mrf.mxu0 }
 0x100   : > { %v608_v58 = vadd.f32 %v607_v49, %v531_v55  ;;  %v682_v59 = vadd.f32 %v681_v56, %v606_v54  ;;  %v1349_v49 = vstv %s1505_s10 }
 0x101   : > { %v683_v60 = vpop.f32.mrf.mxu1  ;;  %v920_v61 = vpop.f32.mrf.mxu0 }
 0x102   : > { %v760_v62 = vadd.f32 %v759_v53, %v682_v59  ;;  %v684_v63 = vadd.f32 %v683_v60, %v608_v58 }
 0x103   : > { %v833_v0 = vpop.f32.mrf.mxu1  ;;  %v922_v1 = vpop.f32.mrf.mxu0 }
 0x104   : > { %v762_v2 = vadd.f32 %v761_v57, %v684_v63  ;;  %v834_v3 = vadd.f32 %v833_v0, %v760_v62 }
 0x105   : > { %v835_v4 = vpop.f32.mrf.mxu1  ;;  %v1079_v5 = vpop.f32.mrf.mxu0 }
 0x106   : > { %v921_v6 = vadd.f32 %v920_v61, %v834_v3  ;;  %v836_v7 = vadd.f32 %v835_v4, %v762_v2 }
 0x107   : > { %v1002_v8 = vpop.f32.mrf.mxu1  ;;  %v1081_v9 = vpop.f32.mrf.mxu0 }
 0x108   : > { %v923_v11 = vadd.f32 %v922_v1, %v836_v7  ;;  %v1003_v12 = vadd.f32 %v1002_v8, %v921_v6 }
 0x109   : > { %v1004_v13 = vpop.f32.mrf.mxu1  ;;  %v1233_v17 = vpop.f32.mrf.mxu0 }
 0x10a   : > { %v1080_v14 = vadd.f32 %v1079_v5, %v1003_v12  ;;  %v1005_v15 = vadd.f32 %v1004_v13, %v923_v11 }
 0x10b   : > { %v1155_v16 = vpop.f32.mrf.mxu1  ;;  %v1235_v23 = vpop.f32.mrf.mxu0 }
 0x10c   : > { %v1082_v18 = vadd.f32 %v1081_v9, %v1005_v15  ;;  %v1156_v19 = vadd.f32 %v1155_v16, %v1080_v14 }
 0x10d   : > { %v1157_v20 = vpop.f32.mrf.mxu1 }
 0x10e   : > { %v1234_v21 = vadd.f32 %v1233_v17, %v1156_v19  ;;  %v1158_v22 = vadd.f32 %v1157_v20, %v1082_v18 }
 0x10f   : > { %v1307_v24 = vpop.f32.mrf.mxu1 }
 0x110   : > { %v1236_v25 = vadd.f32 %v1235_v23, %v1158_v22  ;;  %v1308_v26 = vadd.f32 %v1307_v24, %v1234_v21 }
 0x111   : > { %v1309_v28 = vpop.f32.mrf.mxu1 }
 0x112   : > { %v1318_v30 = vadd.f32 %v1316_v27, %v1308_v26  ;;  %v1310_v31 = vadd.f32 %v1309_v28, %v1236_v25 }
 0x114   : > { %v1319_v32 = vadd.f32 %v1316_v27, %v1310_v31  ;;  %vm1321_vm2 = vcmp.gt.f32.partialorder %v1318_v30, 0.0  ;;  %v1324_v33 = vmul.f32 %v1323_v29, %v1318_v30 }
 0x116   : > { %vm1322_vm3 = vcmp.gt.f32.partialorder %v1319_v32, 0.0  ;;  %v1325_v35 = vmul.f32 %v1323_v29, %v1319_v32  ;;  %v1326_v36 = vsel %vm1321_vm2, %v1318_v30, %v1324_v33 }
 0x117   : > { %v1334_v37 = vmul.f32 %v1332_v34, %v1326_v36 }
 0x118   : > { %v1327_v38 = vsel %vm1322_vm3, %v1319_v32, %v1325_v35 }
 0x119   : > { %v1335_v39 = vmul.f32 %v1332_v34, %v1327_v38  ;;  %v1336_v40 = vrot.slane %v1334_v37, 4 }
 0x11b   : > { %v1337_v41 = vadd.f32 %v1336_v40, %v1334_v37  ;;  %v1342_v42 = vrot.slane %v1335_v39, 4 }
 0x11d   : > { %v1338_v43 = vrot.slane %v1337_v41, 2  ;;  %v1343_v44 = vadd.f32 %v1342_v42, %v1335_v39 }
 0x11f   : > { %v1339_v45 = vadd.f32 %v1338_v43, %v1337_v41  ;;  %v1344_v46 = vrot.slane %v1343_v44, 2 }
 0x121   : > { %v1340_v47 = vrot.slane %v1339_v45, 1  ;;  %v1345_v48 = vadd.f32 %v1344_v46, %v1343_v44 }
 0x123   : > { %v1341_v50 = vadd.f32 %v1340_v47, %v1339_v45  ;;  %v1346_v51 = vrot.slane %v1345_v48, 1 }
 0x125   : > { %v1347_v52 = vadd.f32 %v1346_v51, %v1345_v48  ;;  %v1350_v53 = vadd.f32 %v1349_v49, %v1341_v50 }
 0x127   : > { %v1351_v54 = vadd.f32 %v1349_v49, %v1347_v52  ;;  %v1506_v55 = vmul.f32 -1.442695, %v1350_v53 }
 0x129   : > { %1587 = vpow2.f32 %v1506_v55  ;;  %v1507_v56 = vmul.f32 -1.442695, %v1351_v54 }
 0x12b   : > { %1589 = vpow2.f32 %v1507_v56 }
 0x136   : > { %v1588_v57 = vpop.eup %1587 }
 0x137   : > { %v1358_v58 = vadd.f32 1.0, %v1588_v57 }
 0x138   : > { %v1590_v59 = vpop.eup %1589 }
 0x139   : > { %v1359_v60 = vadd.f32 1.0, %v1590_v59  ;;  %1591 = vrcp.f32 %v1358_v58 }
 0x13b   : > { %1593 = vrcp.f32 %v1359_v60 }
 0x146   : > { %v1592_v61 = vpop.eup %1591 }
 0x148   : > { %v1594_v62 = vpop.eup %1593 }
 0x149   : > { %v1366_v63 = vcombine.low %v1592_v61, %v1594_v62 }
 0x14b   : > { %v1368_v0 = vmul.f32 %v1366_v63, %v1839_v10 }
 0x14d   : > { %1369 = vst [vmem:[%s336_s17] sm:$0xff] %v1368_v0 }
 0x14e   : > { %1623 = shalt.err (!%p1620_p3)
}
 0x14f   : > { %s1624_s10 = scalar_lea.hbm %s1385_s21, 128  ;;  %s1628_s16 = scalar_lea.hbm %s1914_s7, 256 }
 0x150   : > { %p1625_p5 = scmp.ne.s32.totalorder %s1385_s21, %s1624_s10  ;;  %p1629_p9 = scmp.lt.s32.totalorder %s1385_s21, %s1914_s7 }
 0x151   : > { %p1630_p12 = scmp.lt.s32.totalorder %s1628_s16, %s1624_s10 }
 0x152   : > { %p1626_p6 = pnand %p1625_p5, %p1776_p4 }
 0x153   : > { %p1631_p10 = por %p1630_p12, %p1629_p9 }
 0x154   : > { %p1627_p7 = pneg %p1626_p6 }
 0x156   : > { %p1632_p11 = pnand %p1631_p10, %p1627_p7 }
 0x158   : > { %1635 = shalt.err (!%p1632_p11)
}
 0x159   : > { %1520 = dma.vmem_to_hbm [thread:$0]  (%p1776_p4), %s1388_s18, 128, %s1385_s21, %s1371_s22  }
 0x15a PF: > { %p1532_p13 = scmp.ge.s32.totalorder %s1690_s29, 2  ;;  %s1399_s20 = sand.u32 1, %s1670_s24  }
 0x15b   : > { %s1400_s23 = scalar_lea.sflag [#allocation3], %s1399_s20 }
 0x15c   : > { %p1527_p0 = pnand %p1532_p13, %p1783_p8 }
 0x15e   : > { %p1528_p1 = pneg %p1527_p0 }
 0x160   : > { %1665 = dma.done.wait (%p1528_p1), %s1400_s23, 128  }
 0x161   : > { %1667 = vsyncadd (%p1528_p1), %s1400_s23, 4294967168  ;;  %s21_s29 = sadd.s32 1, %s1690_s29   ;;  %s1919_s24 = smov %s1674_s25 }
 0x162   : > { %p18_p2 = scmp.ge.s32.totalorder %s21_s29, 4   ;;  %s1920_s25 = smov %s1678_s26 }
 0x163   : > { %s1921_s26 = smov %s1789_s14  ;;  %s1922_s27 = smov %s1686_s28 }
 0x164   : > { %s1923_s28 = smov %s1925_s9  ;;  %20 = sbr.rel (!%p18_p2) target bundleno = 5 (0x5), region = 91 }
 0x169   :  { %1405 = vsyncpa [#allocation3], 1 }
 0x16a   :  { %1407 = vsyncpa [#allocation3 + $0x1], 1 }
 0x16b   :  { %1408 = vsyncpa [#allocation4], 1 }
 0x16c   :  { %1410 = vsyncpa [#allocation4 + $0x1], 1 }

</bundles_post_ra>
